<compile_context>
chip_gen: v7x
topology: tpu7x:2x2x1
jax: 0.10.0
libtpu: 0.0.40
codegen_flags: <defaults>
</compile_context>

<pallas_src>
import jax
import jax.numpy as jnp
from jax.experimental import pallas as pl
from jax.experimental.pallas import tpu as pltpu

_LANE = 128
_SUBLANE = 8


def _weighter_kernel(x_ref, w_ref, b_ref, o_ref):
    # x_ref: (TB, M, C, TR, L)   w_ref: (M, C, 1, 1)   b_ref: (C, 1, 1)
    # o_ref: (TB, C, TR, L)
    x = x_ref[...].astype(jnp.float32)
    w = w_ref[...]                              # broadcasts over TR, L
    s = jnp.sum(x * w[None], axis=1)            # reduce over models -> (TB, C, TR, L)
    o_ref[...] = jax.nn.sigmoid(s + b_ref[...][None]).astype(o_ref.dtype)


def _pick_tiles(batch, n_models, n_classes, rows, lane, itemsize,
                target_bytes=2 << 20):
    """Pick (batch_tile, row_tile) so the x block is roughly `target_bytes`."""
    bytes_per_row = n_models * n_classes * lane * itemsize
    rows_budget = max(1, target_bytes // bytes_per_row)
    if rows_budget >= rows:
        row_tile = rows                          # whole spatial extent per step
        batch_tile = max(1, min(batch, target_bytes // (bytes_per_row * rows)))
    else:
        row_tile = max(_SUBLANE, (rows_budget // _SUBLANE) * _SUBLANE)
        batch_tile = 1
    return batch_tile, row_tile


def weighter_forward(x, weights, bias):
    """x: (B, M, C, H, W); weights: (1, M, C, 1, 1); bias: (1, 1, C, 1, 1)."""
    B, M, C, H, W = x.shape
    HW = H * W

    if HW % _LANE == 0:
        R, L = HW // _LANE, _LANE                # lane-dense layout
    else:
        R, L = 1, HW                             # fallback: full-dim lane block

    xr = x.reshape(B, M, C, R, L)                # keep input dtype (bf16 stays bf16)
    wr = weights.reshape(M, C, 1, 1).astype(jnp.float32)
    # bias is added *before* the model-sum in the reference module, so the
    # effective post-reduction bias is M * bias.
    br = (jnp.float32(M) * bias).reshape(C, 1, 1).astype(jnp.float32)

    itemsize = xr.dtype.itemsize
    TB, TR = _pick_tiles(B, M, C, R, L, itemsize)
    grid = (pl.cdiv(B, TB), pl.cdiv(R, TR))

    cost = pl.CostEstimate(
        flops=2 * B * M * C * HW + B * C * HW,
        transcendentals=B * C * HW,
        bytes_accessed=(xr.size * itemsize          # x read
                        + B * C * HW * itemsize     # out write
                        + wr.size * 4 + br.size * 4),
    )

    out = pl.pallas_call(
        _weighter_kernel,
        out_shape=jax.ShapeDtypeStruct((B, C, R, L), x.dtype),
        grid=grid,
        in_specs=[
            pl.BlockSpec((TB, M, C, TR, L), lambda b, h: (b, 0, 0, h, 0)),
            pl.BlockSpec((M, C, 1, 1), lambda b, h: (0, 0, 0, 0)),
            pl.BlockSpec((C, 1, 1), lambda b, h: (0, 0, 0)),
        ],
        out_specs=pl.BlockSpec((TB, C, TR, L), lambda b, h: (b, 0, h, 0)),
        compiler_params=pltpu.CompilerParams(
            dimension_semantics=("parallel", "parallel"),
            vmem_limit_bytes=32 * 1024 * 1024,
        ),
        cost_estimate=cost,
    )(xr, wr, br)

    return out.reshape(B, C, H, W)


if __name__ == "__main__":
    # Small shapes consistent with the module's forward.
    B, n_models, n_classes, H, W = 2, 3, 4, 16, 16

    key = jax.random.PRNGKey(0)
    kx, kw, kb = jax.random.split(key, 3)

    # Deterministic parameter init mirroring the PyTorch __init__ (non-zero
    # bias to also exercise the hoisted-bias path).
    weights = (jax.random.normal(kw, (1, n_models, n_classes, 1, 1), jnp.float32)
               * 0.01 + 1.0 / n_models)
    bias = jax.random.normal(kb, (1, 1, n_classes, 1, 1), jnp.float32) * 0.1

    x = jax.random.normal(kx, (B, n_models, n_classes, H, W), jnp.float32)

    out = weighter_forward(x, weights, bias)
    out = jax.block_until_ready(out)

    # Pure-JAX reference for correctness (bias before the model sum, as in torch).
    ref = jax.nn.sigmoid(jnp.sum(x * weights + bias, axis=1))
    assert out.shape == (B, n_classes, H, W)
    assert jnp.allclose(out, ref, atol=1e-5, rtol=1e-5)

    print("KERNEL_OK")
</pallas_src>

<mosaic_0001>
module attributes {stable_mosaic.version = 11 : i64} {
  func.func @_weighter_kernel(%arg0: i32, %arg1: i32, %arg2: memref<2x3x4x2x128xf32, #tpu.memory_space<vmem>>, %arg3: memref<3x4x1x1xf32, #tpu.memory_space<vmem>>, %arg4: memref<4x1x1xf32, #tpu.memory_space<vmem>>, %arg5: memref<2x4x2x128xf32, #tpu.memory_space<vmem>>) attributes {dimension_semantics = [#tpu.dimension_semantics<parallel>, #tpu.dimension_semantics<parallel>], iteration_bounds = array<i64: 1, 1>, scalar_prefetch = 0 : i64, scratch_operands = 0 : i64, tpu.core_type = #tpu.core_type<tc>, window_params = [{transform_indices = @transform_0, window_bounds = array<i64: 2, 3, 4, 2, 128>}, {pipeline_mode = #tpu.pipeline_mode<synchronous>, transform_indices = @transform_1, window_bounds = array<i64: 3, 4, 1, 1>}, {pipeline_mode = #tpu.pipeline_mode<synchronous>, transform_indices = @transform_2, window_bounds = array<i64: 4, 1, 1>}, {transform_indices = @transform_3, window_bounds = array<i64: 2, 4, 2, 128>}]} {
    %c0 = arith.constant 0 : index
    %c0_0 = arith.constant 0 : index
    %c0_1 = arith.constant 0 : index
    %c0_2 = arith.constant 0 : index
    %c0_3 = arith.constant 0 : index
    %0 = vector.load %arg2[%c0, %c0_0, %c0_1, %c0_2, %c0_3] : memref<2x3x4x2x128xf32, #tpu.memory_space<vmem>>, vector<2x3x4x2x128xf32>
    %c0_4 = arith.constant 0 : index
    %c0_5 = arith.constant 0 : index
    %c0_6 = arith.constant 0 : index
    %c0_7 = arith.constant 0 : index
    %1 = vector.load %arg3[%c0_4, %c0_5, %c0_6, %c0_7] : memref<3x4x1x1xf32, #tpu.memory_space<vmem>>, vector<3x4x1x1xf32>
    %2 = vector.shape_cast %1 : vector<3x4x1x1xf32> to vector<1x3x4x1x1xf32>
    %3 = vector.broadcast %2 : vector<1x3x4x1x1xf32> to vector<2x3x4x2x128xf32>
    %4 = arith.mulf %0, %3 : vector<2x3x4x2x128xf32>
    %cst = arith.constant dense<0.000000e+00> : vector<2x4x2x128xf32>
    %5 = vector.multi_reduction <add>, %4, %cst [1] : vector<2x3x4x2x128xf32> to vector<2x4x2x128xf32>
    %c0_8 = arith.constant 0 : index
    %c0_9 = arith.constant 0 : index
    %c0_10 = arith.constant 0 : index
    %6 = vector.load %arg4[%c0_8, %c0_9, %c0_10] : memref<4x1x1xf32, #tpu.memory_space<vmem>>, vector<4x1x1xf32>
    %7 = vector.shape_cast %6 : vector<4x1x1xf32> to vector<1x4x1x1xf32>
    %8 = vector.broadcast %7 : vector<1x4x1x1xf32> to vector<2x4x2x128xf32>
    %9 = arith.addf %5, %8 : vector<2x4x2x128xf32>
    %10 = arith.negf %9 : vector<2x4x2x128xf32>
    %11 = math.exp %10 : vector<2x4x2x128xf32>
    %cst_11 = arith.constant 1.000000e+00 : f32
    %12 = vector.broadcast %cst_11 : f32 to vector<2x4x2x128xf32>
    %13 = arith.addf %12, %11 : vector<2x4x2x128xf32>
    %14 = arith.divf %12, %13 : vector<2x4x2x128xf32>
    %c0_12 = arith.constant 0 : index
    %c0_13 = arith.constant 0 : index
    %c0_14 = arith.constant 0 : index
    %c0_15 = arith.constant 0 : index
    %15 = vector.load %arg5[%c0_12, %c0_13, %c0_14, %c0_15] : memref<2x4x2x128xf32, #tpu.memory_space<vmem>>, vector<2x4x2x128xf32>
    tpu.vector_store %arg5[%c0_12, %c0_13, %c0_14, %c0_15], %14 {strides = array<i32>} : memref<2x4x2x128xf32, #tpu.memory_space<vmem>>, vector<2x4x2x128xf32>,
    return
  }
  func.func @transform_0(%arg0: i32, %arg1: i32) -> (i32, i32, i32, i32, i32) {
    %c0_i32 = arith.constant 0 : i32
    %c0_i32_0 = arith.constant 0 : i32
    %c0_i32_1 = arith.constant 0 : i32
    %c0_i32_2 = arith.constant 0 : i32
    return %arg0, %c0_i32, %c0_i32_0, %arg1, %c0_i32_1 : i32, i32, i32, i32, i32
  }
  func.func @transform_1(%arg0: i32, %arg1: i32) -> (i32, i32, i32, i32) {
    %c0_i32 = arith.constant 0 : i32
    %c0_i32_0 = arith.constant 0 : i32
    %c0_i32_1 = arith.constant 0 : i32
    %c0_i32_2 = arith.constant 0 : i32
    %c0_i32_3 = arith.constant 0 : i32
    return %c0_i32, %c0_i32_0, %c0_i32_1, %c0_i32_2 : i32, i32, i32, i32
  }
  func.func @transform_2(%arg0: i32, %arg1: i32) -> (i32, i32, i32) {
    %c0_i32 = arith.constant 0 : i32
    %c0_i32_0 = arith.constant 0 : i32
    %c0_i32_1 = arith.constant 0 : i32
    %c0_i32_2 = arith.constant 0 : i32
    return %c0_i32, %c0_i32_0, %c0_i32_1 : i32, i32, i32
  }
  func.func @transform_3(%arg0: i32, %arg1: i32) -> (i32, i32, i32, i32) {
    %c0_i32 = arith.constant 0 : i32
    %c0_i32_0 = arith.constant 0 : i32
    %c0_i32_1 = arith.constant 0 : i32
    return %arg0, %c0_i32, %arg1, %c0_i32_0 : i32, i32, i32, i32
  }
}

</mosaic_0001>

<bundles_post_ra>
// kernel: tpu_custom_call.1
= control target key start
LH: loop header
LB: loop body
LE: loop exit
PB: predicated region body
PF: predicated region fallthrough
CT: control target
= control target key end

     0   :  { %8 = vsyncpa [#allocation3], 0  ;;  %s600_s0 = inlined_call_operand.hbm [shape: f32[2,3,4,2,128], index: 0, kind: input, shape index: {}]   ;;  %s601_s1 = inlined_call_operand.vmem [shape: f32[3,4,1,1], index: 1, kind: input, shape index: {}]   ;;  %s602_s2 = inlined_call_operand.vmem [shape: f32[4,1,1], index: 2, kind: input, shape index: {}]   ;;  %s603_s3 = inlined_call_operand.hbm [shape: f32[2,4,2,128], index: 3, kind: output, shape index: {}]  }
   0x1   :  { %9 = vsyncpa [#allocation4], 0  ;;  %s470_s12 = smov [#allocation2]   ;;  %s422_s16 = scalar_lea.hbm %s600_s0, 768 }
   0x2   :  { %s15_s13 = sshll.u32 %s470_s12, 4  ;;  %p423_p0 = scmp.ne.s32.totalorder %s600_s0, %s422_s16  ;;  %s16_s13 = int_to_ptr.vmem [resolvable:$true] %s15_s13 }
   0x3   :  { %p426_p1 = scmp.lt.u32.totalorder %s422_s16, %s600_s0 }
   0x5   :  { %p428_p2 = pnand %p426_p1, %p423_p0 }
   0x7   :  { %431 = shalt.err (!%p428_p2)
}
   0x8   :  { %s432_s21 = scalar_lea.vmem %s16_s13, 768  ;;  %p437_p4 = scmp.lt.s32.totalorder %s16_s13, %s16_s13 }
   0x9   :  { %p433_p3 = scmp.ne.s32.totalorder %s16_s13, %s432_s21  ;;  %p438_p5 = scmp.lt.s32.totalorder %s432_s21, %s432_s21 }
   0xb   :  { %p439_p6 = por %p438_p5, %p437_p4 }
   0xd   :  { %p440_p7 = pnand %p439_p6, %p433_p3 }
   0xf   :  { %443 = shalt.err (!%p440_p7)
}
  0x10   :  { %s471_s22 = smov 32   ;;  %s472_s23 = smov 2  }
  0x11   :  { %21 = dma.hbm_to_vmem [thread:$0]  %s600_s0, 768, %s16_s13, [#allocation3], %s471_s22, %s471_s22, %s472_s23  }
  0x12   :  { %466 = dma.done.wait [#allocation3], 768  }
  0x13   :  { %467 = vsyncadd [#allocation3], 4294966528  ;;  %v473_v0 = vmov 0   ;;  %v361_v1 = vld [vmem:[%s601_s1 + $0x2] ss:$0 sm:$0xff]  ;;  %vm197_vm0 = vcmask 1041408  }
  0x14   :  { %389 = vset.pattern.permute.xlu1 %v473_v0  ;;  %388 = vset.pattern.permute.xlu0 %v473_v0  ;;  %v359_v2 = vld [vmem:[%s601_s1] ss:$0 sm:$0xff]  ;;  %v362_v3 = vld [vmem:[%s601_s1 + $0x3] ss:$0 sm:$0xff]  ;;  %v360_v4 = vld [vmem:[%s601_s1 + $0x1] ss:$0 sm:$0xff] }
  0x15   :  { %134 = vperm.xlu1 %389, %v361_v1   ;;  %126 = vperm.xlu0 %388, %v359_v2   ;;  %v364_v5 = vld [vmem:[%s601_s1 + $0x5] ss:$0 sm:$0xff]  ;;  %v363_v6 = vld [vmem:[%s601_s1 + $0x4] ss:$0 sm:$0xff]  ;;  %v366_v7 = vld [vmem:[%s601_s1 + $0x7] ss:$0 sm:$0xff] }
  0x16   :  { %v365_v8 = vld [vmem:[%s601_s1 + $0x6] ss:$0 sm:$0xff]  ;;  %v368_v9 = vld [vmem:[%s601_s1 + $0x9] ss:$0 sm:$0xff]  ;;  %v367_v10 = vld [vmem:[%s601_s1 + $0x8] ss:$0 sm:$0xff] }
  0x17   :  { %v370_v11 = vld [vmem:[%s601_s1 + $0xb] ss:$0 sm:$0xff]  ;;  %v369_v12 = vld [vmem:[%s601_s1 + $0xa] ss:$0 sm:$0xff]  ;;  %v372_v13 = vld [vmem:[%s602_s2 + $0x1] ss:$0 sm:$0xff] }
  0x18   :  { %v371_v14 = vld [vmem:[%s602_s2] ss:$0 sm:$0xff]  ;;  %v374_v15 = vld [vmem:[%s602_s2 + $0x3] ss:$0 sm:$0xff]  ;;  %v373_v16 = vld [vmem:[%s602_s2 + $0x2] ss:$0 sm:$0xff] }
  0x19   :  { %138 = vperm.xlu1 %389, %v362_v3   ;;  %130 = vperm.xlu0 %388, %v360_v4   ;;  %v31_v21 = vld [vmem:[#allocation2 + $0x4] sm:$0x3]  ;;  %v43_v22 = vld [vmem:[#allocation2 + $0x1c] sm:$0x3]  ;;  %v29_v23 = vld [vmem:[#allocation2] sm:$0x3] }
  0x1a   :  { %v41_v24 = vld [vmem:[#allocation2 + $0x18] sm:$0x3]  ;;  %v32_v25 = vld [vmem:[#allocation2 + $0x6] sm:$0x3]  ;;  %v44_v26 = vld [vmem:[#allocation2 + $0x1e] sm:$0x3] }
  0x1b   :  { %v30_v27 = vld [vmem:[#allocation2 + $0x2] sm:$0x3]  ;;  %v34_v29 = vld [vmem:[#allocation2 + $0xa] sm:$0x3]  ;;  %v33_v32 = vld [vmem:[#allocation2 + $0x8] sm:$0x3] }
  0x1c   :  { %v46_v30 = vld [vmem:[#allocation2 + $0x22] sm:$0x3]  ;;  %v42_v36 = vld [vmem:[#allocation2 + $0x1a] sm:$0x3]  ;;  %v45_v37 = vld [vmem:[#allocation2 + $0x20] sm:$0x3] }
  0x1d   :  { %146 = vperm.xlu1 %389, %v364_v5   ;;  %142 = vperm.xlu0 %388, %v363_v6   ;;  %v36_v45 = vld [vmem:[#allocation2 + $0xe] sm:$0x3]  ;;  %v48_v46 = vld [vmem:[#allocation2 + $0x26] sm:$0x3]  ;;  %v35_v51 = vld [vmem:[#allocation2 + $0xc] sm:$0x3] }
  0x1e   :  { %v38_v52 = vld [vmem:[#allocation2 + $0x12] sm:$0x3]  ;;  %v50_v53 = vld [vmem:[#allocation2 + $0x2a] sm:$0x3]  ;;  %v37_v57 = vld [vmem:[#allocation2 + $0x10] sm:$0x3] }
  0x1f   :  { %v49_v62 = vld [vmem:[#allocation2 + $0x28] sm:$0x3]  ;;  %v47_v3 = vld [vmem:[#allocation2 + $0x24] sm:$0x3]  ;;  %s474_s1 = smov [#allocation5]  }
  0x20   :  { %s347_s2 = sshll.u32 %s474_s1, 4  ;;  %s348_s2 = int_to_ptr.vmem [resolvable:$true] %s347_s2 }
  0x21   :  { %154 = vperm.xlu1 %389, %v366_v7   ;;  %150 = vperm.xlu0 %388, %v365_v8   ;;  %s444_s0 = scalar_lea.vmem %s348_s2, 256  ;;  %p449_p9 = scmp.lt.s32.totalorder %s348_s2, %s348_s2 }
  0x22   :  { %p445_p8 = scmp.ne.s32.totalorder %s348_s2, %s444_s0  ;;  %p450_p10 = scmp.lt.s32.totalorder %s444_s0, %s444_s0 }
  0x24   :  { %p451_p11 = por %p450_p10, %p449_p9 }
  0x25   :  { %162 = vperm.xlu1 %389, %v368_v9   ;;  %158 = vperm.xlu0 %388, %v367_v10  }
  0x26   :  { %p452_p12 = pnand %p451_p11, %p445_p8 }
  0x29   :  { %170 = vperm.xlu1 %389, %v370_v11   ;;  %166 = vperm.xlu0 %388, %v369_v12  }
  0x2d   :  { %267 = vperm.xlu1 %389, %v372_v13   ;;  %263 = vperm.xlu0 %388, %v371_v14   ;;  %v40_v14 = vld [vmem:[#allocation2 + $0x16] sm:$0x3] }
  0x31   :  { %275 = vperm.xlu1 %389, %v374_v15   ;;  %271 = vperm.xlu0 %388, %v373_v16  }
  0x94   :  { %v135_v17 = vpop.permute.xlu1 %134  ;;  %v127_v18 = vpop.permute.xlu0 %126 }
  0x95   :  { %v175_v33 = vmul.f32 %v135_v17, %v31_v21  ;;  %v187_v34 = vmul.f32 %v135_v17, %v43_v22  ;;  %v173_v35 = vmul.f32 %v127_v18, %v29_v23  ;;  %v185_v38 = vmul.f32 %v127_v18, %v41_v24  ;;  %v51_v21 = vld [vmem:[#allocation2 + $0x2c] sm:$0x3] }
  0x97   :  { %v208_v54 = vsel %vm197_vm0, %v175_v33, 0.0  ;;  %v560_v55 = vsel %vm197_vm0, %v187_v34, 0.0  ;;  %v198_v56 = vsel %vm197_vm0, %v173_v35, 0.0  ;;  %v218_v58 = vsel %vm197_vm0, %v185_v38, 0.0 }
  0x98   :  { %v139_v19 = vpop.permute.xlu1 %138  ;;  %v131_v20 = vpop.permute.xlu0 %130 }
  0x99   :  { %v176_v39 = vmul.f32 %v139_v19, %v32_v25  ;;  %v188_v40 = vmul.f32 %v139_v19, %v44_v26  ;;  %v174_v41 = vmul.f32 %v131_v20, %v30_v27  ;;  %v186_v47 = vmul.f32 %v131_v20, %v42_v36  ;;  %v52_v19 = vld [vmem:[#allocation2 + $0x2e] sm:$0x3]  ;;  %v39_v20 = vld [vmem:[#allocation2 + $0x14] sm:$0x3] }
  0x9b   :  { %v213_v59 = vsel %vm197_vm0, %v176_v39, 0.0  ;;  %v233_v60 = vsel %vm197_vm0, %v188_v40, 0.0  ;;  %v203_v61 = vsel %vm197_vm0, %v174_v41, 0.0  ;;  %v223_v4 = vsel %vm197_vm0, %v186_v47, 0.0 }
  0x9c   :  { %v147_v28 = vpop.permute.xlu1 %146  ;;  %v143_v31 = vpop.permute.xlu0 %142 }
  0x9d   :  { %v178_v42 = vmul.f32 %v147_v28, %v34_v29  ;;  %v190_v43 = vmul.f32 %v147_v28, %v46_v30  ;;  %v177_v44 = vmul.f32 %v143_v31, %v33_v32  ;;  %v189_v48 = vmul.f32 %v143_v31, %v45_v37 }
  0x9f   :  { %v204_v63 = vsel %vm197_vm0, %v178_v42, 0.0  ;;  %v224_v0 = vsel %vm197_vm0, %v190_v43, 0.0  ;;  %v199_v1 = vsel %vm197_vm0, %v177_v44, 0.0  ;;  %v219_v5 = vsel %vm197_vm0, %v189_v48, 0.0 }
  0xa0   :  { %v155_v49 = vpop.permute.xlu1 %154  ;;  %v151_v50 = vpop.permute.xlu0 %150  ;;  %v205_v15 = vadd.f32 %v204_v63, %v203_v61  ;;  %v225_v16 = vadd.f32 %v224_v0, %v223_v4  ;;  %v200_v17 = vadd.f32 %v199_v1, %v198_v56  ;;  %v220_v22 = vadd.f32 %v219_v5, %v218_v58 }
  0xa1   :  { %v180_v2 = vmul.f32 %v155_v49, %v36_v45  ;;  %v192_v6 = vmul.f32 %v155_v49, %v48_v46  ;;  %v179_v7 = vmul.f32 %v151_v50, %v35_v51  ;;  %v191_v18 = vmul.f32 %v151_v50, %v47_v3 }
  0xa3   :  { %v214_v23 = vsel %vm197_vm0, %v180_v2, 0.0  ;;  %v234_v26 = vsel %vm197_vm0, %v192_v6, 0.0  ;;  %v209_v27 = vsel %vm197_vm0, %v179_v7, 0.0  ;;  %v229_v36 = vsel %vm197_vm0, %v191_v18, 0.0 }
  0xa4   :  { %v163_v8 = vpop.permute.xlu1 %162  ;;  %v159_v9 = vpop.permute.xlu0 %158  ;;  %v215_v39 = vadd.f32 %v214_v23, %v213_v59  ;;  %v235_v46 = vadd.f32 %v234_v26, %v233_v60  ;;  %v210_v47 = vadd.f32 %v209_v27, %v208_v54  ;;  %v230_v58 = vadd.f32 %v229_v36, %v560_v55 }
  0xa5   :  { %v182_v10 = vmul.f32 %v163_v8, %v38_v52  ;;  %v194_v11 = vmul.f32 %v163_v8, %v50_v53  ;;  %v181_v12 = vmul.f32 %v159_v9, %v37_v57  ;;  %v193_v13 = vmul.f32 %v159_v9, %v49_v62 }
  0xa7   :  { %v206_v24 = vsel %vm197_vm0, %v182_v10, 0.0  ;;  %v226_v25 = vsel %vm197_vm0, %v194_v11, 0.0  ;;  %v201_v28 = vsel %vm197_vm0, %v181_v12, 0.0  ;;  %v221_v29 = vsel %vm197_vm0, %v193_v13, 0.0 }
  0xa8   :  { %v171_v30 = vpop.permute.xlu1 %170  ;;  %v167_v31 = vpop.permute.xlu0 %166  ;;  %v207_v37 = vadd.f32 %v206_v24, %v205_v15  ;;  %v227_v38 = vadd.f32 %v226_v25, %v225_v16  ;;  %v202_v40 = vadd.f32 %v201_v28, %v200_v17  ;;  %v222_v41 = vadd.f32 %v221_v29, %v220_v22 }
  0xa9   :  { %v184_v32 = vmul.f32 %v171_v30, %v40_v14  ;;  %v196_v33 = vmul.f32 %v171_v30, %v52_v19  ;;  %v183_v34 = vmul.f32 %v167_v31, %v39_v20  ;;  %v195_v35 = vmul.f32 %v167_v31, %v51_v21 }
  0xab   :  { %v216_v42 = vsel %vm197_vm0, %v184_v32, 0.0  ;;  %v236_v43 = vsel %vm197_vm0, %v196_v33, 0.0  ;;  %v211_v48 = vsel %vm197_vm0, %v183_v34, 0.0  ;;  %v231_v49 = vsel %vm197_vm0, %v195_v35, 0.0 }
  0xac   :  { %v268_v44 = vpop.permute.xlu1 %267  ;;  %v264_v45 = vpop.permute.xlu0 %263  ;;  %v217_v56 = vadd.f32 %v216_v42, %v215_v39  ;;  %v237_v57 = vadd.f32 %v236_v43, %v235_v46  ;;  %v212_v63 = vadd.f32 %v211_v48, %v210_v47  ;;  %v232_v54 = vadd.f32 %v231_v49, %v230_v58 }
  0xad   :  { %v279_v50 = vadd.f32 %v268_v44, %v207_v37  ;;  %v283_v51 = vadd.f32 %v268_v44, %v227_v38  ;;  %v278_v52 = vadd.f32 %v264_v45, %v202_v40  ;;  %v282_v53 = vadd.f32 %v264_v45, %v222_v41 }
  0xaf   :  { %v376_v59 = vmul.f32 -1.442695, %v279_v50  ;;  %v380_v61 = vmul.f32 -1.442695, %v283_v51  ;;  %v375_v62 = vmul.f32 -1.442695, %v278_v52 }
  0xb0   :  { %v379_v0 = vmul.f32 -1.442695, %v282_v53  ;;  %v276_v1 = vpop.permute.xlu1 %275  ;;  %v272_v60 = vpop.permute.xlu0 %271 }
  0xb1   :  { %390 = vpow2.f32 %v376_v59  ;;  %v281_v2 = vadd.f32 %v276_v1, %v217_v56  ;;  %v285_v3 = vadd.f32 %v276_v1, %v237_v57  ;;  %v280_v4 = vadd.f32 %v272_v60, %v212_v63 }
  0xb2   :  { %392 = vpow2.f32 %v380_v61  ;;  %v284_v5 = vadd.f32 %v272_v60, %v232_v54 }
  0xb3   :  { %394 = vpow2.f32 %v375_v62  ;;  %v378_v6 = vmul.f32 -1.442695, %v281_v2  ;;  %v382_v7 = vmul.f32 -1.442695, %v285_v3  ;;  %v377_v8 = vmul.f32 -1.442695, %v280_v4 }
  0xb4   :  { %396 = vpow2.f32 %v379_v0  ;;  %v381_v55 = vmul.f32 -1.442695, %v284_v5 }
  0xb5   :  { %398 = vpow2.f32 %v378_v6 }
  0xb6   :  { %400 = vpow2.f32 %v382_v7 }
  0xb7   :  { %402 = vpow2.f32 %v377_v8 }
  0xb8   :  { %404 = vpow2.f32 %v381_v55 }
  0xbb   :  { %v391_v9 = vpop.eup %390 }
  0xbc   :  { %v393_v10 = vpop.eup %392  ;;  %v311_v11 = vadd.f32 1.0, %v391_v9 }
  0xbd   :  { %v395_v12 = vpop.eup %394  ;;  %v315_v13 = vadd.f32 1.0, %v393_v10 }
  0xbe   :  { %v397_v14 = vpop.eup %396  ;;  %406 = vrcp.f32 %v311_v11  ;;  %v310_v15 = vadd.f32 1.0, %v395_v12 }
  0xbf   :  { %v399_v16 = vpop.eup %398  ;;  %408 = vrcp.f32 %v315_v13  ;;  %v314_v17 = vadd.f32 1.0, %v397_v14 }
  0xc0   :  { %v401_v18 = vpop.eup %400  ;;  %410 = vrcp.f32 %v310_v15  ;;  %v313_v19 = vadd.f32 1.0, %v399_v16 }
  0xc1   :  { %v403_v20 = vpop.eup %402  ;;  %412 = vrcp.f32 %v314_v17  ;;  %v317_v21 = vadd.f32 1.0, %v401_v18 }
  0xc2   :  { %v405_v22 = vpop.eup %404  ;;  %414 = vrcp.f32 %v313_v19  ;;  %v312_v23 = vadd.f32 1.0, %v403_v20 }
  0xc3   :  { %416 = vrcp.f32 %v317_v21  ;;  %v316_v24 = vadd.f32 1.0, %v405_v22 }
  0xc4   :  { %418 = vrcp.f32 %v312_v23 }
  0xc5   :  { %420 = vrcp.f32 %v316_v24 }
  0xc8   :  { %v407_v25 = vpop.eup %406 }
  0xc9   :  { %v409_v26 = vpop.eup %408  ;;  %335 = vst [vmem:[#allocation5 + $0x2] sm:$0x3] %v407_v25 }
  0xca   :  { %v411_v27 = vpop.eup %410  ;;  %339 = vst [vmem:[#allocation5 + $0xa] sm:$0x3] %v409_v26 }
  0xcb   :  { %v413_v28 = vpop.eup %412  ;;  %334 = vst [vmem:[#allocation5] sm:$0x3] %v411_v27 }
  0xcc   :  { %v415_v29 = vpop.eup %414  ;;  %338 = vst [vmem:[#allocation5 + $0x8] sm:$0x3] %v413_v28 }
  0xcd   :  { %v417_v30 = vpop.eup %416  ;;  %337 = vst [vmem:[#allocation5 + $0x6] sm:$0x3] %v415_v29 }
  0xce   :  { %v419_v31 = vpop.eup %418  ;;  %341 = vst [vmem:[#allocation5 + $0xe] sm:$0x3] %v417_v30 }
  0xcf   :  { %v421_v32 = vpop.eup %420  ;;  %336 = vst [vmem:[#allocation5 + $0x4] sm:$0x3] %v419_v31 }
  0xd0   :  { %340 = vst [vmem:[#allocation5 + $0xc] sm:$0x3] %v421_v32 }
  0xd1   :  { %455 = shalt.err (!%p452_p12)
}
  0xd2   :  { %s456_s7 = scalar_lea.hbm %s603_s3, 256 }
  0xd3   :  { %p457_p13 = scmp.ne.s32.totalorder %s603_s3, %s456_s7  ;;  %p460_p0 = scmp.lt.u32.totalorder %s456_s7, %s603_s3 }
  0xd5   :  { %p462_p1 = pnand %p460_p0, %p457_p13 }
  0xd7   :  { %465 = shalt.err (!%p462_p1)
}
  0xd8   :  { %353 = dma.vmem_to_hbm [thread:$0]  %s348_s2, 256, %s603_s3, [#allocation4], %s471_s22, %s471_s22, %s472_s23  }
  0xd9   :  { %468 = dma.done.wait [#allocation4], 256  }
  0xda   :  { %469 = vsyncadd [#allocation4], 4294967040 }
  0xdb   :  { %357 = vsyncpa [#allocation3], 1 }
  0xdc   :  { %358 = vsyncpa [#allocation4], 1 }

</bundles_post_ra>
